<compile_context>
chip_gen: v7x
topology: tpu7x:2x2x1
jax: 0.10.0
libtpu: 0.0.40
codegen_flags: <defaults>
</compile_context>

<pallas_src>
import functools

import jax
import jax.numpy as jnp
from jax.experimental import pallas as pl
from jax.experimental.pallas import tpu as pltpu


def _round_up(n, m):
    return ((n + m - 1) // m) * m


def mlp_kernel(x_ref, p_ref, o_ref, *, dims, offs):
    n_feature, n_hidden, n_out = dims
    o_wh, o_bh, o_w2, o_b2, o_wo, o_bo = offs
    B = x_ref.shape[0]

    # Single packed-parameter load; static slices (sublane-aligned offsets) split it.
    p = p_ref[...]
    wh = p[o_wh:o_wh + n_feature, :n_hidden]
    w2 = p[o_w2:o_w2 + n_hidden, :n_hidden]        # shared layer: loaded once, reused 6x
    wo = p[o_wo:o_wo + n_hidden, :n_out]
    bh = jnp.broadcast_to(p[o_bh:o_bh + 1, :n_hidden], (B, n_hidden))   # hoisted broadcasts
    b2 = jnp.broadcast_to(p[o_b2:o_b2 + 1, :n_hidden], (B, n_hidden))
    bo = jnp.broadcast_to(p[o_bo:o_bo + 1, :n_out], (B, n_out))

    # Hidden layer (all f32, f32 accumulation on the MXU).
    h = jnp.maximum(jnp.dot(x_ref[...], wh, preferred_element_type=jnp.float32) + bh, 0.0)

    # Six applications of the shared h2h layer (kept unrolled: short dependent chain).
    for _ in range(6):
        h = jnp.maximum(jnp.dot(h, w2, preferred_element_type=jnp.float32) + b2, 0.0)

    # Output layer (no activation).
    o_ref[...] = jnp.dot(h, wo, preferred_element_type=jnp.float32) + bo


def pack_params(params, n_feature, n_hidden, n_output):
    """Pack all six parameter arrays into one f32 buffer (one DMA instead of six).

    Each piece's rows are padded to a multiple of 8 (sublane-aligned static offsets) and
    its lane width padded to max(n_hidden, n_output). Returns (packed, static_offsets).
    """
    del n_feature  # shapes carry it
    lane = max(n_hidden, n_output)

    def pad_piece(a):
        rows = _round_up(a.shape[0], 8)
        return jnp.pad(a, ((0, rows - a.shape[0]), (0, lane - a.shape[1])))

    pieces = [pad_piece(a) for a in params]
    offs, off = [], 0
    for piece in pieces:
        offs.append(off)
        off += piece.shape[0]
    packed = jnp.concatenate(pieces, axis=0)
    return packed, tuple(offs)


def net_forward(x, packed_params, offs, dims, *, batch_tile=512):
    n_feature, n_hidden, n_out = dims
    B = x.shape[0]

    # Batch tiling: one grid step at small B; multiple "parallel" steps at large B
    # (shards across both TensorCores on v7x; whole problem still trivially fits VMEM).
    tb = min(batch_tile, _round_up(B, 8))
    Bp = _round_up(B, tb)
    xp = jnp.pad(x, ((0, Bp - B), (0, 0))) if Bp != B else x
    grid = (Bp // tb,)

    # Advisory cost hint: 8 matmuls + bias adds + 7 ReLUs, operands touched once.
    flops = (2 * Bp * (n_feature * n_hidden + 6 * n_hidden * n_hidden + n_hidden * n_out)
             + 8 * Bp * n_hidden + 7 * Bp * n_hidden)
    bytes_accessed = (xp.size * xp.dtype.itemsize
                      + packed_params.size * packed_params.dtype.itemsize
                      + Bp * n_out * 4)
    cost = pl.CostEstimate(flops=flops, transcendentals=0, bytes_accessed=bytes_accessed)

    kernel = functools.partial(mlp_kernel, dims=dims, offs=offs)
    out = pl.pallas_call(
        kernel,
        out_shape=jax.ShapeDtypeStruct((Bp, n_out), jnp.float32),
        grid=grid,
        in_specs=[
            pl.BlockSpec((tb, n_feature), lambda i: (i, 0)),
            # Packed params: same block every step -> stays resident in VMEM.
            pl.BlockSpec(packed_params.shape, lambda i: (0, 0)),
        ],
        out_specs=pl.BlockSpec((tb, n_out), lambda i: (i, 0)),
        compiler_params=pltpu.CompilerParams(dimension_semantics=("parallel",)),
        cost_estimate=cost,
    )(xp, packed_params)
    return out[:B] if Bp != B else out


def init_params(key, n_feature, n_hidden, n_output):
    # Deterministic init mirroring torch.nn.Linear's uniform(-1/sqrt(fan_in), 1/sqrt(fan_in)).
    ks = jax.random.split(key, 6)

    def lin(kw, kb, fan_in, fan_out):
        bound = 1.0 / jnp.sqrt(fan_in)
        w = jax.random.uniform(kw, (fan_in, fan_out), jnp.float32, -bound, bound)
        b = jax.random.uniform(kb, (1, fan_out), jnp.float32, -bound, bound)
        return w, b

    wh, bh = lin(ks[0], ks[1], n_feature, n_hidden)
    w2, b2 = lin(ks[2], ks[3], n_hidden, n_hidden)
    wo, bo = lin(ks[4], ks[5], n_hidden, n_output)
    return wh, bh, w2, b2, wo, bo


def net_reference(x, params):
    # Pure-JAX f32 reference of the torch forward pass (highest precision matmuls).
    wh, bh, w2, b2, wo, bo = params
    hp = jax.lax.Precision.HIGHEST
    h = jnp.maximum(jnp.dot(x, wh, precision=hp) + bh, 0.0)
    for _ in range(6):
        h = jnp.maximum(jnp.dot(h, w2, precision=hp) + b2, 0.0)
    return jnp.dot(h, wo, precision=hp) + bo


if __name__ == "__main__":
    B, n_feature, n_hidden, n_output = 8, 16, 32, 4
    key = jax.random.PRNGKey(0)
    kx, kp = jax.random.split(key)
    x = jax.random.normal(kx, (B, n_feature), jnp.float32)
    params = init_params(kp, n_feature, n_hidden, n_output)

    packed, offs = pack_params(params, n_feature, n_hidden, n_output)
    out = net_forward(x, packed, offs, (n_feature, n_hidden, n_output))
    out = jax.block_until_ready(out)

    ref = net_reference(x, params)
    assert out.shape == (B, n_output)
    # Full f32 path now -> much tighter tolerance than the previous bf16 version.
    assert jnp.allclose(out, ref, atol=1e-3, rtol=1e-3)
    print("KERNEL_OK")
</pallas_src>

<mosaic_0001>
module attributes {stable_mosaic.version = 11 : i64} {
  func.func @mlp_kernel(%arg0: i32, %arg1: memref<8x16xf32, #tpu.memory_space<vmem>>, %arg2: memref<104x32xf32, #tpu.memory_space<vmem>>, %arg3: memref<8x4xf32, #tpu.memory_space<vmem>>) attributes {dimension_semantics = [#tpu.dimension_semantics<parallel>], iteration_bounds = array<i64: 1>, scalar_prefetch = 0 : i64, scratch_operands = 0 : i64, tpu.core_type = #tpu.core_type<tc>, window_params = [{transform_indices = @transform_0, window_bounds = array<i64: 8, 16>}, {pipeline_mode = #tpu.pipeline_mode<synchronous>, transform_indices = @transform_1, window_bounds = array<i64: 104, 32>}, {transform_indices = @transform_2, window_bounds = array<i64: 8, 4>}]} {
    %c0 = arith.constant 0 : index
    %c0_0 = arith.constant 0 : index
    %0 = vector.load %arg2[%c0, %c0_0] : memref<104x32xf32, #tpu.memory_space<vmem>>, vector<104x32xf32>
    %1 = vector.extract_strided_slice %0 {offsets = [0, 0], sizes = [16, 32], strides = [1, 1]} : vector<104x32xf32> to vector<16x32xf32>
    %2 = vector.extract_strided_slice %0 {offsets = [24, 0], sizes = [32, 32], strides = [1, 1]} : vector<104x32xf32> to vector<32x32xf32>
    %3 = vector.extract_strided_slice %0 {offsets = [64, 0], sizes = [32, 4], strides = [1, 1]} : vector<104x32xf32> to vector<32x4xf32>
    %4 = vector.extract_strided_slice %0 {offsets = [16, 0], sizes = [1, 32], strides = [1, 1]} : vector<104x32xf32> to vector<1x32xf32>
    %5 = vector.shape_cast %4 : vector<1x32xf32> to vector<1x32xf32>
    %6 = vector.broadcast %5 : vector<1x32xf32> to vector<8x32xf32>
    %7 = vector.extract_strided_slice %0 {offsets = [56, 0], sizes = [1, 32], strides = [1, 1]} : vector<104x32xf32> to vector<1x32xf32>
    %8 = vector.shape_cast %7 : vector<1x32xf32> to vector<1x32xf32>
    %9 = vector.broadcast %8 : vector<1x32xf32> to vector<8x32xf32>
    %10 = vector.extract_strided_slice %0 {offsets = [96, 0], sizes = [1, 4], strides = [1, 1]} : vector<104x32xf32> to vector<1x4xf32>
    %11 = vector.shape_cast %10 : vector<1x4xf32> to vector<1x4xf32>
    %12 = vector.broadcast %11 : vector<1x4xf32> to vector<8x4xf32>
    %c0_1 = arith.constant 0 : index
    %c0_2 = arith.constant 0 : index
    %13 = vector.load %arg1[%c0_1, %c0_2] : memref<8x16xf32, #tpu.memory_space<vmem>>, vector<8x16xf32>
    %cst = arith.constant dense<0.000000e+00> : vector<8x32xf32>
    %14 = tpu.matmul %13, %1, %cst {dimension_numbers = #tpu.dot_dimension_numbers<[1], [0], [0], [1], [0, 0, 1, 1], [], []>} : vector<8x16xf32>, vector<16x32xf32>, vector<8x32xf32> -> vector<8x32xf32>
    %15 = arith.addf %14, %6 : vector<8x32xf32>
    %cst_3 = arith.constant 0.000000e+00 : f32
    %16 = vector.broadcast %cst_3 : f32 to vector<8x32xf32>
    %17 = arith.maximumf %15, %16 : vector<8x32xf32>
    %cst_4 = arith.constant dense<0.000000e+00> : vector<8x32xf32>
    %18 = tpu.matmul %17, %2, %cst_4 {dimension_numbers = #tpu.dot_dimension_numbers<[1], [0], [0], [1], [0, 0, 1, 1], [], []>} : vector<8x32xf32>, vector<32x32xf32>, vector<8x32xf32> -> vector<8x32xf32>
    %19 = arith.addf %18, %9 : vector<8x32xf32>
    %cst_5 = arith.constant 0.000000e+00 : f32
    %20 = vector.broadcast %cst_5 : f32 to vector<8x32xf32>
    %21 = arith.maximumf %19, %20 : vector<8x32xf32>
    %cst_6 = arith.constant dense<0.000000e+00> : vector<8x32xf32>
    %22 = tpu.matmul %21, %2, %cst_6 {dimension_numbers = #tpu.dot_dimension_numbers<[1], [0], [0], [1], [0, 0, 1, 1], [], []>} : vector<8x32xf32>, vector<32x32xf32>, vector<8x32xf32> -> vector<8x32xf32>
    %23 = arith.addf %22, %9 : vector<8x32xf32>
    %cst_7 = arith.constant 0.000000e+00 : f32
    %24 = vector.broadcast %cst_7 : f32 to vector<8x32xf32>
    %25 = arith.maximumf %23, %24 : vector<8x32xf32>
    %cst_8 = arith.constant dense<0.000000e+00> : vector<8x32xf32>
    %26 = tpu.matmul %25, %2, %cst_8 {dimension_numbers = #tpu.dot_dimension_numbers<[1], [0], [0], [1], [0, 0, 1, 1], [], []>} : vector<8x32xf32>, vector<32x32xf32>, vector<8x32xf32> -> vector<8x32xf32>
    %27 = arith.addf %26, %9 : vector<8x32xf32>
    %cst_9 = arith.constant 0.000000e+00 : f32
    %28 = vector.broadcast %cst_9 : f32 to vector<8x32xf32>
    %29 = arith.maximumf %27, %28 : vector<8x32xf32>
    %cst_10 = arith.constant dense<0.000000e+00> : vector<8x32xf32>
    %30 = tpu.matmul %29, %2, %cst_10 {dimension_numbers = #tpu.dot_dimension_numbers<[1], [0], [0], [1], [0, 0, 1, 1], [], []>} : vector<8x32xf32>, vector<32x32xf32>, vector<8x32xf32> -> vector<8x32xf32>
    %31 = arith.addf %30, %9 : vector<8x32xf32>
    %cst_11 = arith.constant 0.000000e+00 : f32
    %32 = vector.broadcast %cst_11 : f32 to vector<8x32xf32>
    %33 = arith.maximumf %31, %32 : vector<8x32xf32>
    %cst_12 = arith.constant dense<0.000000e+00> : vector<8x32xf32>
    %34 = tpu.matmul %33, %2, %cst_12 {dimension_numbers = #tpu.dot_dimension_numbers<[1], [0], [0], [1], [0, 0, 1, 1], [], []>} : vector<8x32xf32>, vector<32x32xf32>, vector<8x32xf32> -> vector<8x32xf32>
    %35 = arith.addf %34, %9 : vector<8x32xf32>
    %cst_13 = arith.constant 0.000000e+00 : f32
    %36 = vector.broadcast %cst_13 : f32 to vector<8x32xf32>
    %37 = arith.maximumf %35, %36 : vector<8x32xf32>
    %cst_14 = arith.constant dense<0.000000e+00> : vector<8x32xf32>
    %38 = tpu.matmul %37, %2, %cst_14 {dimension_numbers = #tpu.dot_dimension_numbers<[1], [0], [0], [1], [0, 0, 1, 1], [], []>} : vector<8x32xf32>, vector<32x32xf32>, vector<8x32xf32> -> vector<8x32xf32>
    %39 = arith.addf %38, %9 : vector<8x32xf32>
    %cst_15 = arith.constant 0.000000e+00 : f32
    %40 = vector.broadcast %cst_15 : f32 to vector<8x32xf32>
    %41 = arith.maximumf %39, %40 : vector<8x32xf32>
    %cst_16 = arith.constant dense<0.000000e+00> : vector<8x4xf32>
    %42 = tpu.matmul %41, %3, %cst_16 {dimension_numbers = #tpu.dot_dimension_numbers<[1], [0], [0], [1], [0, 0, 1, 1], [], []>} : vector<8x32xf32>, vector<32x4xf32>, vector<8x4xf32> -> vector<8x4xf32>
    %43 = arith.addf %42, %12 : vector<8x4xf32>
    %c0_17 = arith.constant 0 : index
    %c0_18 = arith.constant 0 : index
    %44 = vector.load %arg3[%c0_17, %c0_18] : memref<8x4xf32, #tpu.memory_space<vmem>>, vector<8x4xf32>
    tpu.vector_store %arg3[%c0_17, %c0_18], %43 {strides = array<i32>} : memref<8x4xf32, #tpu.memory_space<vmem>>, vector<8x4xf32>,
    return
  }
  func.func @transform_0(%arg0: i32) -> (i32, i32) {
    %c0_i32 = arith.constant 0 : i32
    %c0_i32_0 = arith.constant 0 : i32
    return %arg0, %c0_i32 : i32, i32
  }
  func.func @transform_1(%arg0: i32) -> (i32, i32) {
    %c0_i32 = arith.constant 0 : i32
    %c0_i32_0 = arith.constant 0 : i32
    %c0_i32_1 = arith.constant 0 : i32
    return %c0_i32, %c0_i32_0 : i32, i32
  }
  func.func @transform_2(%arg0: i32) -> (i32, i32) {
    %c0_i32 = arith.constant 0 : i32
    %c0_i32_0 = arith.constant 0 : i32
    return %arg0, %c0_i32 : i32, i32
  }
}

</mosaic_0001>

<bundles_post_ra>
// kernel: tpu_custom_call.1
= control target key start
LH: loop header
LB: loop body
LE: loop exit
PB: predicated region body
PF: predicated region fallthrough
CT: control target
= control target key end

     0   :  { %v814_v0 = vmov 0.0|0.0   ;;  %vm815_vm0 = vmmov 0   ;;  %v816_v3 = vmov 0.0   ;;  %vm37_vm1 = vcmask 130048   ;;  %s920_s1 = inlined_call_operand.vmem [shape: f32[104,32], index: 1, kind: input, shape index: {}]   ;;  %s921_s0 = inlined_call_operand.vmem [shape: f32[8,16], index: 0, kind: input, shape index: {}]   ;;  %s922_s2 = inlined_call_operand.vmem [shape: f32[8,4], index: 2, kind: output, shape index: {}]  }
   0x1   :  { %766 = vmatprep.subr.bf16.mxu0 %v814_v0  ;;  %v11_v1 = vld [vmem:[%s920_s1] sm:$0xff]  ;;  %v12_v2 = vld [vmem:[%s920_s1 + $0x8] sm:$0xff]  ;;  %686 = vmatprep.mubr.msk.f32.mxu0 %vm815_vm0, %v816_v3  ;;  %v14_v5 = vld [vmem:[%s920_s1 + $0x18] sm:$0xff]  ;;  %v24_v12 = vlaneseq  ;;  %vm112_vm2 = vcmask 261120   ;;  %vm630_vm3 = vcmask 31744  }
   0x2   :  { %v767_v4 = vpack.c.bf16 %v12_v2, %v11_v1  ;;  %769 = vmatprep.subr.bf16.mxu1 %v814_v0  ;;  %v15_v6 = vld [vmem:[%s920_s1 + $0x20] sm:$0xff]  ;;  %697 = vmatprep.mubr.msk.f32.mxu1 %vm815_vm0, %v816_v3  ;;  %v16_v9 = vld [vmem:[%s920_s1 + $0x28] sm:$0xff]  ;;  %v17_v10 = vld [vmem:[%s920_s1 + $0x30] sm:$0xff] }
   0x3   :  { %v770_v7 = vpack.c.bf16 %v15_v6, %v14_v5  ;;  %v36_v8 = vld [vmem:[%s921_s0] sm:$0xff]  ;;  %v773_v11 = vpack.c.bf16 %v17_v10, %v16_v9  ;;  %v25_v13 = vshrl.u32 %v24_v12, 7  ;;  %v13_v15 = vld [vmem:[%s920_s1 + $0x10] sm:$0xff]  ;;  %v18_v21 = vld [vmem:[%s920_s1 + $0x38] sm:$0xff] }
   0x4   :  { %768 = vmatpush3.bf16.msra.mxu0 %v767_v4  ;;  %v19_v39 = vld [vmem:[%s920_s1 + $0x40] sm:$0xff]  ;;  %v20_v40 = vld [vmem:[%s920_s1 + $0x48] sm:$0xff]  ;;  %v21_v46 = vld [vmem:[%s920_s1 + $0x50] sm:$0xff] }
   0x5   :  { %771 = vmatpush3.bf16.msra.mxu1 %v770_v7  ;;  %775 = vmatprep.subr.bf16.mxu0 %v814_v0  ;;  %v866_v14 = vsub.s32 0, %v25_v13  ;;  %v806_v41 = vpack.c.bf16 %v20_v40, %v19_v39  ;;  %v22_v47 = vld [vmem:[%s920_s1 + $0x58] sm:$0xff]  ;;  %v23_v53 = vld [vmem:[%s920_s1 + $0x60] sm:$0xff] }
   0x6   :  { %772 = vmatprep.subr.bf16.mxu1 %v814_v0  ;;  %v809_v48 = vpack.c.bf16 %v22_v47, %v21_v46 }
   0x7   :  { %687 = vmatmul.mubr.msk.f32.vlgmr.msra.gmra.mrb[0].mxu0 %vm37_vm1, %v36_v8  ;;  %v27_v16 = vrot.slane %v13_v15, %v866_v14  ;;  %v31_v22 = vrot.slane %v18_v21, %v866_v14  ;;  %v35_v54 = vrot.slane %v23_v53, %v866_v14 }
   0x8   :  { %777 = vmatpush3.bf16.msra.mxu0 %v770_v7  ;;  %708 = vmatprep.mubr.msk.f32.mxu0 %vm815_vm0, %v816_v3 }
   0x9   :  { %778 = vmatprep.subr.bf16.mxu0 %v814_v0  ;;  %774 = vmatpush3.bf16.msra.mxu1 %v773_v11 }
   0xa   :  { %781 = vmatprep.subr.bf16.mxu1 %v814_v0 }
   0xc   :  { %780 = vmatpush3.bf16.msra.mxu0 %v773_v11 }
   0xd   :  { %787 = vmatprep.subr.bf16.mxu0 %v814_v0 }
  0xda   :  { %v107_v17 = vpop.f32.mrb[0].mxu0 }
  0xdb   :  { %v108_v18 = vadd.f32 %v107_v17, %v27_v16  ;;  %v688_v19 = vpop.f32.mrb[1].mxu0 }
  0xdd   :  { %v111_v20 = vmax.f32 %v108_v18, 0.0 }
  0xdf   :  { %698 = vmatmul.mubr.msk.f32.vlgmr.msra.gmra.mrb[0].mxu1 %vm112_vm2, %v111_v20 }
  0xe0   :  { %783 = vmatpush3.bf16.msra.mxu1 %v770_v7  ;;  %719 = vmatprep.mubr.msk.f32.mxu1 %vm815_vm0, %v816_v3 }
  0xe1   :  { %784 = vmatprep.subr.bf16.mxu1 %v814_v0 }
  0xe4   :  { %786 = vmatpush3.bf16.msra.mxu1 %v773_v11 }
  0xe5   :  { %793 = vmatprep.subr.bf16.mxu1 %v814_v0 }
 0x1b2   :  { %v182_v23 = vpop.f32.mrb[0].mxu1 }
 0x1b3   :  { %v183_v24 = vadd.f32 %v182_v23, %v31_v22  ;;  %v699_v25 = vpop.f32.mrb[1].mxu1 }
 0x1b5   :  { %v186_v26 = vmax.f32 %v183_v24, 0.0 }
 0x1b7   :  { %709 = vmatmul.mubr.msk.f32.vlgmr.msra.gmra.mrb[2].mxu0 %vm112_vm2, %v186_v26 }
 0x1b8   :  { %789 = vmatpush3.bf16.msra.mxu0 %v770_v7  ;;  %730 = vmatprep.mubr.msk.f32.mxu0 %vm815_vm0, %v816_v3 }
 0x1b9   :  { %790 = vmatprep.subr.bf16.mxu0 %v814_v0 }
 0x1bc   :  { %792 = vmatpush3.bf16.msra.mxu0 %v773_v11 }
 0x1bd   :  { %799 = vmatprep.subr.bf16.mxu0 %v814_v0 }
 0x28a   :  { %v256_v27 = vpop.f32.mrb[2].mxu0 }
 0x28b   :  { %v257_v28 = vadd.f32 %v256_v27, %v31_v22  ;;  %v710_v29 = vpop.f32.mrb[3].mxu0 }
 0x28d   :  { %v260_v30 = vmax.f32 %v257_v28, 0.0 }
 0x28f   :  { %720 = vmatmul.mubr.msk.f32.vlgmr.msra.gmra.mrb[2].mxu1 %vm112_vm2, %v260_v30 }
 0x290   :  { %795 = vmatpush3.bf16.msra.mxu1 %v770_v7  ;;  %741 = vmatprep.mubr.msk.f32.mxu1 %vm815_vm0, %v816_v3 }
 0x291   :  { %796 = vmatprep.subr.bf16.mxu1 %v814_v0 }
 0x294   :  { %798 = vmatpush3.bf16.msra.mxu1 %v773_v11 }
 0x295   :  { %805 = vmatprep.subr.bf16.mxu1 %v814_v0 }
 0x362   :  { %v330_v31 = vpop.f32.mrb[2].mxu1 }
 0x363   :  { %v331_v32 = vadd.f32 %v330_v31, %v31_v22  ;;  %v721_v33 = vpop.f32.mrb[3].mxu1 }
 0x365   :  { %v334_v34 = vmax.f32 %v331_v32, 0.0 }
 0x367   :  { %731 = vmatmul.mubr.msk.f32.vlgmr.msra.gmra.mrb[4].mxu0 %vm112_vm2, %v334_v34 }
 0x368   :  { %801 = vmatpush3.bf16.msra.mxu0 %v770_v7  ;;  %752 = vmatprep.mubr.msk.f32.mxu0 %vm815_vm0, %v816_v3 }
 0x369   :  { %802 = vmatprep.subr.bf16.mxu0 %v814_v0 }
 0x36c   :  { %804 = vmatpush3.bf16.msra.mxu0 %v773_v11 }
 0x43a   :  { %v404_v35 = vpop.f32.mrb[4].mxu0 }
 0x43b   :  { %v405_v36 = vadd.f32 %v404_v35, %v31_v22  ;;  %v732_v37 = vpop.f32.mrb[5].mxu0 }
 0x43d   :  { %v408_v38 = vmax.f32 %v405_v36, 0.0 }
 0x43f   :  { %742 = vmatmul.mubr.msk.f32.vlgmr.msra.gmra.mrb[4].mxu1 %vm112_vm2, %v408_v38 }
 0x440   :  { %763 = vmatprep.mubr.msk.f32.mxu1 %vm815_vm0, %v816_v3  ;;  %807 = vmatpush3.bf16.msra.mxu1 %v806_v41 }
 0x441   :  { %808 = vmatprep.subr.bf16.mxu1 %v814_v0 }
 0x444   :  { %810 = vmatpush3.bf16.msra.mxu1 %v809_v48 }
 0x512   :  { %v478_v42 = vpop.f32.mrb[4].mxu1 }
 0x513   :  { %v479_v43 = vadd.f32 %v478_v42, %v31_v22  ;;  %v743_v44 = vpop.f32.mrb[5].mxu1 }
 0x515   :  { %v482_v45 = vmax.f32 %v479_v43, 0.0 }
 0x517   :  { %753 = vmatmul.mubr.msk.f32.vlgmr.msra.gmra.mrb[6].mxu0 %vm112_vm2, %v482_v45 }
 0x5ea   :  { %v552_v49 = vpop.f32.mrb[6].mxu0 }
 0x5eb   :  { %v553_v50 = vadd.f32 %v552_v49, %v31_v22  ;;  %v754_v51 = vpop.f32.mrb[7].mxu0 }
 0x5ed   :  { %v556_v52 = vmax.f32 %v553_v50, 0.0 }
 0x5ef   :  { %764 = vmatmul.mubr.msk.f32.vlgmr.msra.gmra.mrb[6].mxu1 %vm112_vm2, %v556_v52 }
 0x6c2   :  { %v626_v55 = vpop.f32.mrb[6].mxu1 }
 0x6c3   :  { %v627_v56 = vadd.f32 %v626_v55, %v35_v54  ;;  %v765_v57 = vpop.f32.mrb[7].mxu1 }
 0x6c5   :  { %631 = vst.msk [vmem:[%s922_s2] sm:$0xff] %vm630_vm3, %v627_v56 }

</bundles_post_ra>
